<compile_context>
chip_gen: v6e
topology: v6e:2x2x1
jax: 0.10.0
libtpu: 0.0.40
codegen_flags: <defaults>
</compile_context>

<pallas_src>
import functools

import jax
import jax.numpy as jnp
from jax.experimental import pallas as pl
from jax.experimental.pallas import tpu as pltpu


def _dwsep_kernel(xflat_ref, wtap_ref, bdw_ref, wpw_ref, bpw_ref, out_ref, *,
                  tap_offsets, sw, compute_dtype):
    """One batch element per grid step.

    xflat_ref: (1, C, L)    padded image, rows flattened (h*Wp + w), lane-padded to L, f32
    wtap_ref : (T, CM, C)   per-tap block-diagonal depthwise weights (compute_dtype)
    bdw_ref  : (CM, 1)      depthwise bias, f32
    wpw_ref  : (Co, CM)     pointwise 1x1 weight (compute_dtype)
    bpw_ref  : (Co, 1)      pointwise bias, f32
    out_ref  : (1, Co, SW)  flattened output slab, SW = Ho*Wp (cols ow >= Wo are junk), f32
    """
    xf = xflat_ref[0]                                          # (C, L) f32, VMEM resident
    # Depthwise conv: sum over the KH*KW taps.  Each tap is a static lane-offset slice of the
    # flattened padded image (in-kernel im2col -> no 9x HBM read amplification), multiplied by
    # a tiny block-diagonal weight on the MXU with f32 accumulation.
    acc = None
    for t, off in enumerate(tap_offsets):                      # static, fully unrolled
        tap = xf[:, off:off + sw].astype(compute_dtype)        # (C, SW)
        contrib = jnp.dot(wtap_ref[t], tap,
                          preferred_element_type=jnp.float32)  # (CM, SW) f32
        acc = contrib if acc is None else acc + contrib
    dw = jnp.maximum(acc + bdw_ref[...], 0.0)                  # bias + ReLU on the VPU, f32
    # Pointwise 1x1 conv: one MXU matmul, f32 accumulate, lane-dense output slab.
    out = jnp.dot(wpw_ref[...], dw.astype(compute_dtype),
                  preferred_element_type=jnp.float32) + bpw_ref[...]
    out_ref[0] = out


def depthwise_separable_conv(x, w_dw, b_dw, w_pw, b_pw, *, padding=1, stride=1,
                             compute_dtype=jnp.float32):
    """x: (N, C, H, W) f32.  PyTorch weight conventions:
       w_dw: (C*4, 1, KH, KW), b_dw: (C*4,), w_pw: (Co, C*4, 1, 1), b_pw: (Co,)."""
    assert stride == 1  # TODO(synk): stride > 1 not needed for the module defaults
    N, C, H, W = x.shape
    CM = w_dw.shape[0]
    M = CM // C
    KH, KW = int(w_dw.shape[2]), int(w_dw.shape[3])
    T = KH * KW
    Co = w_pw.shape[0]
    Hp, Wp = H + 2 * padding, W + 2 * padding
    Ho, Wo = Hp - KH + 1, Wp - KW + 1
    SW = Ho * Wp                                   # output slab width; cols ow >= Wo are junk
    max_off = (KH - 1) * Wp + (KW - 1)             # largest tap offset used by the kernel
    L = -(-max(Hp * Wp, max_off + SW) // 128) * 128  # lane-pad the flattened image buffer

    # ---- activation prep: pad + flatten only (1x traffic; no im2col expansion in HBM) ----
    x = x.astype(jnp.float32)
    xp = jnp.pad(x, ((0, 0), (0, 0), (padding, padding), (padding, padding)))
    xflat = xp.reshape(N, C, Hp * Wp)
    xflat = jnp.pad(xflat, ((0, 0), (0, 0), (0, L - Hp * Wp)))          # (N, C, L)

    # ---- per-tap block-diagonal depthwise weights (runs once; tiny) ----
    # wtap[t, c*M+m, c2] = w_dw[c*M+m, 0, ky, kx] * (c == c2), t = ky*KW + kx
    w_flat = w_dw.reshape(C, M, T).astype(jnp.float32)                  # (C, M, T)
    eye = jnp.eye(C, dtype=jnp.float32)
    wtap = jnp.einsum('cmt,cd->tcmd', w_flat, eye).reshape(T, CM, C).astype(compute_dtype)
    wpw = w_pw.reshape(Co, CM).astype(compute_dtype)                    # (Co, CM)
    bdw = b_dw.reshape(CM, 1).astype(jnp.float32)
    bpw = b_pw.reshape(Co, 1).astype(jnp.float32)

    tap_offsets = tuple(ky * Wp + kx for ky in range(KH) for kx in range(KW))
    kernel = functools.partial(_dwsep_kernel, tap_offsets=tap_offsets, sw=SW,
                               compute_dtype=compute_dtype)

    out = pl.pallas_call(
        kernel,
        out_shape=jax.ShapeDtypeStruct((N, Co, SW), jnp.float32),
        grid=(N,),                                   # one image per step
        in_specs=[
            pl.BlockSpec((1, C, L), lambda n: (n, 0, 0)),        # per-image padded rows
            pl.BlockSpec((T, CM, C), lambda n: (0, 0, 0)),       # weights: constant block idx
            pl.BlockSpec((CM, 1), lambda n: (0, 0)),             #   -> stay VMEM-resident,
            pl.BlockSpec((Co, CM), lambda n: (0, 0)),            #      not re-DMA'd per step
            pl.BlockSpec((Co, 1), lambda n: (0, 0)),
        ],
        out_specs=pl.BlockSpec((1, Co, SW), lambda n: (n, 0, 0)),
        compiler_params=pltpu.CompilerParams(
            dimension_semantics=("parallel",),       # v7x: split batch across the 2 TCs
        ),
    )(xflat, wtap, bdw, wpw, bpw)

    # (N, Co, Ho*Wp) -> (N, Co, Ho, Wo): reshape + drop junk columns; no transpose kernel.
    return out.reshape(N, Co, Ho, Wp)[:, :, :, :Wo]


def reference_forward(x, w_dw, b_dw, w_pw, b_pw, padding=1, stride=1):
    """Pure-JAX reference matching the PyTorch module semantics."""
    C = x.shape[1]
    dw = jax.lax.conv_general_dilated(
        x, w_dw, window_strides=(stride, stride),
        padding=((padding, padding), (padding, padding)),
        dimension_numbers=("NCHW", "OIHW", "NCHW"),
        feature_group_count=C)
    dw = jnp.maximum(dw + b_dw[None, :, None, None], 0.0)
    pw = jax.lax.conv_general_dilated(
        dw, w_pw, window_strides=(1, 1), padding=((0, 0), (0, 0)),
        dimension_numbers=("NCHW", "OIHW", "NCHW"))
    return pw + b_pw[None, :, None, None]


if __name__ == "__main__":
    key = jax.random.PRNGKey(0)
    k_x, k_wdw, k_bdw, k_wpw, k_bpw = jax.random.split(key, 5)

    # Small shapes consistent with the module: in_channels=4, out_channels=8, kernel=3.
    N, C, H, W = 2, 4, 16, 16
    KH = KW = 3
    M = 4                      # depthwise channel multiplier (in_channels * 4)
    Co = 8                     # out_channels

    x = jax.random.normal(k_x, (N, C, H, W), dtype=jnp.float32)
    w_dw = 0.1 * jax.random.normal(k_wdw, (C * M, 1, KH, KW), dtype=jnp.float32)
    b_dw = 0.1 * jax.random.normal(k_bdw, (C * M,), dtype=jnp.float32)
    w_pw = 0.1 * jax.random.normal(k_wpw, (Co, C * M, 1, 1), dtype=jnp.float32)
    b_pw = 0.1 * jax.random.normal(k_bpw, (Co,), dtype=jnp.float32)

    ref = jax.block_until_ready(reference_forward(x, w_dw, b_dw, w_pw, b_pw))

    # f32 operands: exact path, tight tolerance.
    fwd_f32 = jax.jit(functools.partial(
        depthwise_separable_conv, padding=1, stride=1, compute_dtype=jnp.float32))
    out_f32 = jax.block_until_ready(fwd_f32(x, w_dw, b_dw, w_pw, b_pw))
    assert out_f32.shape == (N, Co, H, W), out_f32.shape
    assert jnp.allclose(out_f32, ref, rtol=1e-4, atol=1e-4), \
        float(jnp.max(jnp.abs(out_f32 - ref)))

    # bf16 MXU operands (f32 accumulate): the performance configuration for v5e/v6e/v7x;
    # tolerance relaxed accordingly (biases and accumulation stay f32).
    fwd_bf16 = jax.jit(functools.partial(
        depthwise_separable_conv, padding=1, stride=1, compute_dtype=jnp.bfloat16))
    out_bf16 = jax.block_until_ready(fwd_bf16(x, w_dw, b_dw, w_pw, b_pw))
    assert out_bf16.shape == (N, Co, H, W), out_bf16.shape
    assert jnp.allclose(out_bf16, ref, rtol=2e-2, atol=2e-2), \
        float(jnp.max(jnp.abs(out_bf16 - ref)))

    print("KERNEL_OK")
</pallas_src>

<mosaic_0001>
module attributes {stable_mosaic.version = 11 : i64} {
  func.func @_dwsep_kernel(%arg0: i32, %arg1: memref<1x4x384xf32, #tpu.memory_space<vmem>>, %arg2: memref<9x16x4xf32, #tpu.memory_space<vmem>>, %arg3: memref<16x1xf32, #tpu.memory_space<vmem>>, %arg4: memref<8x16xf32, #tpu.memory_space<vmem>>, %arg5: memref<8x1xf32, #tpu.memory_space<vmem>>, %arg6: memref<1x8x288xf32, #tpu.memory_space<vmem>>) attributes {dimension_semantics = [#tpu.dimension_semantics<parallel>], iteration_bounds = array<i64: 2>, scalar_prefetch = 0 : i64, scratch_operands = 0 : i64, tpu.core_type = #tpu.core_type<tc>, window_params = [{transform_indices = @transform_0, window_bounds = array<i64: 1, 4, 384>}, {pipeline_mode = #tpu.pipeline_mode<synchronous>, transform_indices = @transform_1, window_bounds = array<i64: 9, 16, 4>}, {pipeline_mode = #tpu.pipeline_mode<synchronous>, transform_indices = @transform_2, window_bounds = array<i64: 16, 1>}, {pipeline_mode = #tpu.pipeline_mode<synchronous>, transform_indices = @transform_3, window_bounds = array<i64: 8, 16>}, {pipeline_mode = #tpu.pipeline_mode<synchronous>, transform_indices = @transform_4, window_bounds = array<i64: 8, 1>}, {transform_indices = @transform_5, window_bounds = array<i64: 1, 8, 288>}]} {
    %c0 = arith.constant 0 : index
    %c0_0 = arith.constant 0 : index
    %c0_1 = arith.constant 0 : index
    %0 = vector.load %arg1[%c0, %c0_0, %c0_1] : memref<1x4x384xf32, #tpu.memory_space<vmem>>, vector<1x4x384xf32>
    %1 = vector.shape_cast %0 : vector<1x4x384xf32> to vector<4x384xf32>
    %2 = vector.extract_strided_slice %1 {offsets = [0, 0], sizes = [4, 288], strides = [1, 1]} : vector<4x384xf32> to vector<4x288xf32>
    %c0_2 = arith.constant 0 : index
    %c0_3 = arith.constant 0 : index
    %c0_4 = arith.constant 0 : index
    %3 = vector.load %arg2[%c0_2, %c0_3, %c0_4] : memref<9x16x4xf32, #tpu.memory_space<vmem>>, vector<1x16x4xf32>
    %4 = vector.shape_cast %3 : vector<1x16x4xf32> to vector<16x4xf32>
    %cst = arith.constant dense<0.000000e+00> : vector<16x288xf32>
    %5 = tpu.matmul %4, %2, %cst {dimension_numbers = #tpu.dot_dimension_numbers<[1], [0], [0], [1], [0, 0, 1, 1], [], []>} : vector<16x4xf32>, vector<4x288xf32>, vector<16x288xf32> -> vector<16x288xf32>
    %6 = vector.extract_strided_slice %1 {offsets = [0, 1], sizes = [4, 288], strides = [1, 1]} : vector<4x384xf32> to vector<4x288xf32>
    %c1 = arith.constant 1 : index
    %c0_5 = arith.constant 0 : index
    %c0_6 = arith.constant 0 : index
    %7 = vector.load %arg2[%c1, %c0_5, %c0_6] : memref<9x16x4xf32, #tpu.memory_space<vmem>>, vector<1x16x4xf32>
    %8 = vector.shape_cast %7 : vector<1x16x4xf32> to vector<16x4xf32>
    %cst_7 = arith.constant dense<0.000000e+00> : vector<16x288xf32>
    %9 = tpu.matmul %8, %6, %cst_7 {dimension_numbers = #tpu.dot_dimension_numbers<[1], [0], [0], [1], [0, 0, 1, 1], [], []>} : vector<16x4xf32>, vector<4x288xf32>, vector<16x288xf32> -> vector<16x288xf32>
    %10 = arith.addf %5, %9 : vector<16x288xf32>
    %11 = vector.extract_strided_slice %1 {offsets = [0, 2], sizes = [4, 288], strides = [1, 1]} : vector<4x384xf32> to vector<4x288xf32>
    %c2 = arith.constant 2 : index
    %c0_8 = arith.constant 0 : index
    %c0_9 = arith.constant 0 : index
    %12 = vector.load %arg2[%c2, %c0_8, %c0_9] : memref<9x16x4xf32, #tpu.memory_space<vmem>>, vector<1x16x4xf32>
    %13 = vector.shape_cast %12 : vector<1x16x4xf32> to vector<16x4xf32>
    %cst_10 = arith.constant dense<0.000000e+00> : vector<16x288xf32>
    %14 = tpu.matmul %13, %11, %cst_10 {dimension_numbers = #tpu.dot_dimension_numbers<[1], [0], [0], [1], [0, 0, 1, 1], [], []>} : vector<16x4xf32>, vector<4x288xf32>, vector<16x288xf32> -> vector<16x288xf32>
    %15 = arith.addf %10, %14 : vector<16x288xf32>
    %16 = vector.extract_strided_slice %1 {offsets = [0, 18], sizes = [4, 288], strides = [1, 1]} : vector<4x384xf32> to vector<4x288xf32>
    %c3 = arith.constant 3 : index
    %c0_11 = arith.constant 0 : index
    %c0_12 = arith.constant 0 : index
    %17 = vector.load %arg2[%c3, %c0_11, %c0_12] : memref<9x16x4xf32, #tpu.memory_space<vmem>>, vector<1x16x4xf32>
    %18 = vector.shape_cast %17 : vector<1x16x4xf32> to vector<16x4xf32>
    %cst_13 = arith.constant dense<0.000000e+00> : vector<16x288xf32>
    %19 = tpu.matmul %18, %16, %cst_13 {dimension_numbers = #tpu.dot_dimension_numbers<[1], [0], [0], [1], [0, 0, 1, 1], [], []>} : vector<16x4xf32>, vector<4x288xf32>, vector<16x288xf32> -> vector<16x288xf32>
    %20 = arith.addf %15, %19 : vector<16x288xf32>
    %21 = vector.extract_strided_slice %1 {offsets = [0, 19], sizes = [4, 288], strides = [1, 1]} : vector<4x384xf32> to vector<4x288xf32>
    %c4 = arith.constant 4 : index
    %c0_14 = arith.constant 0 : index
    %c0_15 = arith.constant 0 : index
    %22 = vector.load %arg2[%c4, %c0_14, %c0_15] : memref<9x16x4xf32, #tpu.memory_space<vmem>>, vector<1x16x4xf32>
    %23 = vector.shape_cast %22 : vector<1x16x4xf32> to vector<16x4xf32>
    %cst_16 = arith.constant dense<0.000000e+00> : vector<16x288xf32>
    %24 = tpu.matmul %23, %21, %cst_16 {dimension_numbers = #tpu.dot_dimension_numbers<[1], [0], [0], [1], [0, 0, 1, 1], [], []>} : vector<16x4xf32>, vector<4x288xf32>, vector<16x288xf32> -> vector<16x288xf32>
    %25 = arith.addf %20, %24 : vector<16x288xf32>
    %26 = vector.extract_strided_slice %1 {offsets = [0, 20], sizes = [4, 288], strides = [1, 1]} : vector<4x384xf32> to vector<4x288xf32>
    %c5 = arith.constant 5 : index
    %c0_17 = arith.constant 0 : index
    %c0_18 = arith.constant 0 : index
    %27 = vector.load %arg2[%c5, %c0_17, %c0_18] : memref<9x16x4xf32, #tpu.memory_space<vmem>>, vector<1x16x4xf32>
    %28 = vector.shape_cast %27 : vector<1x16x4xf32> to vector<16x4xf32>
    %cst_19 = arith.constant dense<0.000000e+00> : vector<16x288xf32>
    %29 = tpu.matmul %28, %26, %cst_19 {dimension_numbers = #tpu.dot_dimension_numbers<[1], [0], [0], [1], [0, 0, 1, 1], [], []>} : vector<16x4xf32>, vector<4x288xf32>, vector<16x288xf32> -> vector<16x288xf32>
    %30 = arith.addf %25, %29 : vector<16x288xf32>
    %31 = vector.extract_strided_slice %1 {offsets = [0, 36], sizes = [4, 288], strides = [1, 1]} : vector<4x384xf32> to vector<4x288xf32>
    %c6 = arith.constant 6 : index
    %c0_20 = arith.constant 0 : index
    %c0_21 = arith.constant 0 : index
    %32 = vector.load %arg2[%c6, %c0_20, %c0_21] : memref<9x16x4xf32, #tpu.memory_space<vmem>>, vector<1x16x4xf32>
    %33 = vector.shape_cast %32 : vector<1x16x4xf32> to vector<16x4xf32>
    %cst_22 = arith.constant dense<0.000000e+00> : vector<16x288xf32>
    %34 = tpu.matmul %33, %31, %cst_22 {dimension_numbers = #tpu.dot_dimension_numbers<[1], [0], [0], [1], [0, 0, 1, 1], [], []>} : vector<16x4xf32>, vector<4x288xf32>, vector<16x288xf32> -> vector<16x288xf32>
    %35 = arith.addf %30, %34 : vector<16x288xf32>
    %36 = vector.extract_strided_slice %1 {offsets = [0, 37], sizes = [4, 288], strides = [1, 1]} : vector<4x384xf32> to vector<4x288xf32>
    %c7 = arith.constant 7 : index
    %c0_23 = arith.constant 0 : index
    %c0_24 = arith.constant 0 : index
    %37 = vector.load %arg2[%c7, %c0_23, %c0_24] : memref<9x16x4xf32, #tpu.memory_space<vmem>>, vector<1x16x4xf32>
    %38 = vector.shape_cast %37 : vector<1x16x4xf32> to vector<16x4xf32>
    %cst_25 = arith.constant dense<0.000000e+00> : vector<16x288xf32>
    %39 = tpu.matmul %38, %36, %cst_25 {dimension_numbers = #tpu.dot_dimension_numbers<[1], [0], [0], [1], [0, 0, 1, 1], [], []>} : vector<16x4xf32>, vector<4x288xf32>, vector<16x288xf32> -> vector<16x288xf32>
    %40 = arith.addf %35, %39 : vector<16x288xf32>
    %41 = vector.extract_strided_slice %1 {offsets = [0, 38], sizes = [4, 288], strides = [1, 1]} : vector<4x384xf32> to vector<4x288xf32>
    %c8 = arith.constant 8 : index
    %c0_26 = arith.constant 0 : index
    %c0_27 = arith.constant 0 : index
    %42 = vector.load %arg2[%c8, %c0_26, %c0_27] : memref<9x16x4xf32, #tpu.memory_space<vmem>>, vector<1x16x4xf32>
    %43 = vector.shape_cast %42 : vector<1x16x4xf32> to vector<16x4xf32>
    %cst_28 = arith.constant dense<0.000000e+00> : vector<16x288xf32>
    %44 = tpu.matmul %43, %41, %cst_28 {dimension_numbers = #tpu.dot_dimension_numbers<[1], [0], [0], [1], [0, 0, 1, 1], [], []>} : vector<16x4xf32>, vector<4x288xf32>, vector<16x288xf32> -> vector<16x288xf32>
    %45 = arith.addf %40, %44 : vector<16x288xf32>
    %c0_29 = arith.constant 0 : index
    %c0_30 = arith.constant 0 : index
    %46 = vector.load %arg3[%c0_29, %c0_30] : memref<16x1xf32, #tpu.memory_space<vmem>>, vector<16x1xf32>
    %47 = vector.broadcast %46 : vector<16x1xf32> to vector<16x288xf32>
    %48 = arith.addf %45, %47 : vector<16x288xf32>
    %cst_31 = arith.constant 0.000000e+00 : f32
    %49 = vector.broadcast %cst_31 : f32 to vector<16x288xf32>
    %50 = arith.maximumf %48, %49 : vector<16x288xf32>
    %c0_32 = arith.constant 0 : index
    %c0_33 = arith.constant 0 : index
    %51 = vector.load %arg4[%c0_32, %c0_33] : memref<8x16xf32, #tpu.memory_space<vmem>>, vector<8x16xf32>
    %cst_34 = arith.constant dense<0.000000e+00> : vector<8x288xf32>
    %52 = tpu.matmul %51, %50, %cst_34 {dimension_numbers = #tpu.dot_dimension_numbers<[1], [0], [0], [1], [0, 0, 1, 1], [], []>} : vector<8x16xf32>, vector<16x288xf32>, vector<8x288xf32> -> vector<8x288xf32>
    %c0_35 = arith.constant 0 : index
    %c0_36 = arith.constant 0 : index
    %53 = vector.load %arg5[%c0_35, %c0_36] : memref<8x1xf32, #tpu.memory_space<vmem>>, vector<8x1xf32>
    %54 = vector.broadcast %53 : vector<8x1xf32> to vector<8x288xf32>
    %55 = arith.addf %52, %54 : vector<8x288xf32>
    %c0_37 = arith.constant 0 : index
    %c0_38 = arith.constant 0 : index
    %c0_39 = arith.constant 0 : index
    %56 = vector.load %arg6[%c0_37, %c0_38, %c0_39] : memref<1x8x288xf32, #tpu.memory_space<vmem>>, vector<1x8x288xf32>
    %57 = vector.shape_cast %56 : vector<1x8x288xf32> to vector<8x288xf32>
    %58 = vector.shape_cast %55 : vector<8x288xf32> to vector<1x8x288xf32>
    tpu.vector_store %arg6[%c0_37, %c0_38, %c0_39], %58 {strides = array<i32>} : memref<1x8x288xf32, #tpu.memory_space<vmem>>, vector<1x8x288xf32>,
    return
  }
  func.func @transform_0(%arg0: i32) -> (i32, i32, i32) {
    %c0_i32 = arith.constant 0 : i32
    %c0_i32_0 = arith.constant 0 : i32
    %c0_i32_1 = arith.constant 0 : i32
    return %arg0, %c0_i32, %c0_i32_0 : i32, i32, i32
  }
  func.func @transform_1(%arg0: i32) -> (i32, i32, i32) {
    %c0_i32 = arith.constant 0 : i32
    %c0_i32_0 = arith.constant 0 : i32
    %c0_i32_1 = arith.constant 0 : i32
    %c0_i32_2 = arith.constant 0 : i32
    return %c0_i32, %c0_i32_0, %c0_i32_1 : i32, i32, i32
  }
  func.func @transform_2(%arg0: i32) -> (i32, i32) {
    %c0_i32 = arith.constant 0 : i32
    %c0_i32_0 = arith.constant 0 : i32
    %c0_i32_1 = arith.constant 0 : i32
    return %c0_i32, %c0_i32_0 : i32, i32
  }
  func.func @transform_3(%arg0: i32) -> (i32, i32) {
    %c0_i32 = arith.constant 0 : i32
    %c0_i32_0 = arith.constant 0 : i32
    %c0_i32_1 = arith.constant 0 : i32
    return %c0_i32, %c0_i32_0 : i32, i32
  }
  func.func @transform_4(%arg0: i32) -> (i32, i32) {
    %c0_i32 = arith.constant 0 : i32
    %c0_i32_0 = arith.constant 0 : i32
    %c0_i32_1 = arith.constant 0 : i32
    return %c0_i32, %c0_i32_0 : i32, i32
  }
  func.func @transform_5(%arg0: i32) -> (i32, i32, i32) {
    %c0_i32 = arith.constant 0 : i32
    %c0_i32_0 = arith.constant 0 : i32
    %c0_i32_1 = arith.constant 0 : i32
    return %arg0, %c0_i32, %c0_i32_0 : i32, i32, i32
  }
}

</mosaic_0001>

<bundles_post_ra>
// kernel: depthwise_separable_conv.1
= control target key start
LH: loop header
LB: loop body
LE: loop exit
PB: predicated region body
PF: predicated region fallthrough
CT: control target
= control target key end

     0   :  { %s2328_s18 = smov 0   ;;  %s2542_s0 = inlined_call_operand.vmem [shape: f32[2,4,384], index: 0, kind: input, shape index: {}]   ;;  %s2543_s1 = inlined_call_operand.vmem [shape: f32[9,16,4], index: 1, kind: input, shape index: {}]   ;;  %s2544_s2 = inlined_call_operand.vmem [shape: f32[16,1], index: 2, kind: input, shape index: {}]   ;;  %s2545_s3 = inlined_call_operand.vmem [shape: f32[8,16], index: 3, kind: input, shape index: {}]   ;;  %s2546_s4 = inlined_call_operand.vmem [shape: f32[8,1], index: 4, kind: input, shape index: {}]   ;;  %s2547_s5 = inlined_call_operand.vmem [shape: f32[2,8,288], index: 5, kind: output, shape index: {}]  }
   0x1 LB: > { %s2083_s19 = sadd.s32 4294967295, %s2285_s18   ;;  %p2087_p0 = scmp.ge.s32.totalorder %s2285_s18, 1  ;;  %s2285_s18 = sphi %s2328_s18, %s15_s18  }
   0x2   : > { %p187_p1 = scmp.lt.s32.totalorder %s2285_s18, 3 }
   0x4   : > { %p188_p2 = pnand %p2087_p0, %p187_p1 }
   0x5   : > { %p215_p3 = scmp.lt.s32.totalorder (!%p188_p2), %s2083_s19, 1  ;;  %s2288_s26 = smov (!%p188_p2), 127  }
   0x6   : > { %191 = sbr.rel (%p188_p2) target bundleno = 595 (0x253), region = 40  ;;  %s2289_s27 = smov (!%p188_p2), 126  }
   0x7   : > { %s2290_s28 = smov (!%p188_p2), 110   ;;  %s2291_s29 = smov (!%p188_p2), 109  }
   0x8   : > { %s2292_s30 = smov (!%p188_p2), 108   ;;  %s2293_s6 = smov (!%p188_p2), 92  }
   0x9   : > { %s2294_s7 = smov (!%p188_p2), 91   ;;  %s2295_s8 = smov (!%p188_p2), 90  }
   0xb   : > { %v2339_v0 = vld [vmem:[%s2543_s1 + $0x10] sm:$0xff]  ;;  %vm244_vm0 = vcmask 31744   ;;  %s2549_s19 = smov (!%p215_p3, %s2083_s19), 1  ;;  %v2287_v1 = vmov 0.0   ;;  %v1849_v5 = vld [vmem:[%s2544_s2 + $0x8] sm:$0xff]  ;;  %v1848_v6 = vld [vmem:[%s2544_s2] sm:$0xff] }
   0xc   : > { %2205 = vmatprep.mubr.msk.f32.mxu1 %vm244_vm0, %v2339_v0  ;;  %322 = vmatprep.mubr.f32.mxu0 %v2287_v1  ;;  %s2255_s22 = smul.u32 12, %s2549_s19  ;;  %v2296_v7 = vmov 0   ;;  %v1873_v8 = vld [vmem:[%s2546_s4] sm:$0xff]  ;;  %vm251_vm1 = vcmask 1043456   ;;  %vm241_vm2 = vcmask 1039360   ;;  %v2091_v13 = vld [vmem:[%s2543_s1 + $0x18] sm:$0xff] }
   0xd   : > { %2276 = vset.pattern.permute.xlu0 %v2296_v7  ;;  %2277 = vset.pattern.permute.xlu1 %v2296_v7  ;;  %vm583_vm3 = vcmask 1031168   ;;  %v227_v17 = vld [vmem:[%s2543_s1] sm:$0xff]  ;;  %vm765_vm4 = vcmask 900096   ;;  %v228_v21 = vld [vmem:[%s2543_s1 + $0x8] sm:$0xff]  ;;  %vm947_vm5 = vcmask 891904   ;;  %v2115_v31 = vld [vmem:[%s2543_s1 + $0x30] sm:$0xff] }
   0xe   : > { %s219_s25 = scalar_lea.vmem %s2542_s0, %s2255_s22  ;;  %v2106_v23 = vld [vmem:[%s2543_s1 + $0x20] sm:$0xff]  ;;  %v2107_v27 = vld [vmem:[%s2543_s1 + $0x28] sm:$0xff]  ;;  %vm1129_vm6 = vcmask 883712   ;;  %v2116_v35 = vld [vmem:[%s2543_s1 + $0x38] sm:$0xff]  ;;  %vm1311_vm7 = vcmask 752640   ;;  %vm1493_vm8 = vcmask 744448  }
   0xf   : > { %v2350_v2 = vld [vmem:[%s219_s25] sm:$0xff]  ;;  %v226_v4 = vld [vmem:[%s219_s25 + $0x8] sm:$0xf]  ;;  %v2133_v45 = vld [vmem:[%s2543_s1 + $0x50] sm:$0xff]  ;;  %vm1675_vm9 = vcmask 736256   ;;  %vm2297_vm10 = vmmov 0  }
  0x10   : > { %235 = vrot.lane.b32.xlu1 %v2350_v2, %s2288_s26  ;;  %v234_v3 = vcombine.high %v2350_v2, %v2350_v2  ;;  %v2124_v37 = vld [vmem:[%s2543_s1 + $0x40] sm:$0xff]  ;;  %v2125_v41 = vld [vmem:[%s2543_s1 + $0x48] sm:$0xff]  ;;  %v2134_v49 = vld [vmem:[%s2543_s1 + $0x58] sm:$0xff]  ;;  %vm1879_vm11 = vcmask 130048   ;;  %vm2026_vm12 = vcmask 261120  }
  0x11   : > { %v2142_v51 = vld [vmem:[%s2543_s1 + $0x60] sm:$0xff]  ;;  %v2143_v54 = vld [vmem:[%s2543_s1 + $0x68] sm:$0xff]  ;;  %v2151_v58 = vld [vmem:[%s2543_s1 + $0x70] sm:$0xff] }
  0x12   : > { %237 = vrot.lane.b32.xlu0 %v234_v3, %s2288_s26  ;;  %v2152_v62 = vld [vmem:[%s2543_s1 + $0x78] sm:$0xff]  ;;  %v2160_v63 = vld [vmem:[%s2543_s1 + $0x80] sm:$0xff] }
  0x14   : > { %579 = vrot.lane.b32.xlu1 %v234_v3, %s2289_s27 }
  0x16   : > { %239 = vrot.lane.b32.xlu0 %v226_v4, %s2288_s26 }
  0x18   : > { %577 = vrot.lane.b32.xlu1 %v2350_v2, %s2289_s27 }
  0x1a   : > { %581 = vrot.lane.b32.xlu0 %v226_v4, %s2289_s27 }
  0x1c   : > { %761 = vrot.lane.b32.xlu1 %v234_v3, %s2290_s28 }
  0x1e   : > { %763 = vrot.lane.b32.xlu0 %v226_v4, %s2290_s28 }
  0x20   : > { %943 = vrot.lane.b32.xlu1 %v234_v3, %s2291_s29 }
  0x22   : > { %759 = vrot.lane.b32.xlu0 %v2350_v2, %s2290_s28 }
  0x24   : > { %941 = vrot.lane.b32.xlu1 %v2350_v2, %s2291_s29 }
  0x26   : > { %945 = vrot.lane.b32.xlu0 %v226_v4, %s2291_s29 }
  0x28   : > { %1125 = vrot.lane.b32.xlu1 %v234_v3, %s2292_s30 }
  0x2a   : > { %1127 = vrot.lane.b32.xlu0 %v226_v4, %s2292_s30 }
  0x2c   : > { %1307 = vrot.lane.b32.xlu1 %v234_v3, %s2293_s6 }
  0x2e   : > { %1123 = vrot.lane.b32.xlu0 %v2350_v2, %s2292_s30  ;;  %s2256_s30 = smul.u32 24, %s2549_s19 }
  0x30   : > { %1305 = vrot.lane.b32.xlu1 %v2350_v2, %s2293_s6 }
  0x32   : > { %1309 = vrot.lane.b32.xlu0 %v226_v4, %s2293_s6 }
  0x34   : > { %1489 = vrot.lane.b32.xlu1 %v234_v3, %s2294_s7 }
  0x36   : > { %1491 = vrot.lane.b32.xlu0 %v226_v4, %s2294_s7 }
  0x38   : > { %1671 = vrot.lane.b32.xlu1 %v234_v3, %s2295_s8 }
  0x3a   : > { %1487 = vrot.lane.b32.xlu0 %v2350_v2, %s2294_s7 }
  0x3c   : > { %1669 = vrot.lane.b32.xlu1 %v2350_v2, %s2295_s8 }
  0x3e   : > { %1673 = vrot.lane.b32.xlu0 %v226_v4, %s2295_s8  ;;  %s224_s8 = scalar_lea.vmem %s2547_s5, %s2256_s30 }
  0x40   : > { %1852 = vperm.xlu1 %2277, %v1848_v6  }
  0x42   : > { %1857 = vperm.xlu0 %2276, %v1849_v5  }
  0x44   : > { %1876 = vperm.xlu1 %2277, %v1873_v8  }
  0x82   : > { %v236_v9 = vpop.permute.xlu1 %235 }
  0x84   : > { %v238_v10 = vpop.permute.xlu0 %237 }
  0x85   : > { %v242_v15 = vsel %vm241_vm2, %v236_v9, %v238_v10 }
  0x86   : > { %v580_v11 = vpop.permute.xlu1 %579 }
  0x88   : > { %v240_v12 = vpop.permute.xlu0 %239 }
  0x89   : > { %2203 = vmatprep.subr.msk.mxu1 %vm251_vm1, %v240_v12  ;;  %v243_v14 = vsel %vm241_vm2, %v238_v10, %v240_v12 }
  0x8a   : > { %2092 = vmatprep.subr.msk.mxu0 %vm251_vm1, %v243_v14  ;;  %2204 = vmatpush3.msk.msra.mxu1 %vm251_vm1, %v240_v12  ;;  %v578_v16 = vpop.permute.xlu1 %577 }
  0x8b   : > { %2093 = vmatpush1.msk.msra.mxu0 %vm251_vm1, %v242_v15  ;;  %2206 = vmatmul.mubr.msk.f32.vlgmr.msra.gmra.mxu1 %vm244_vm0, %v2091_v13  ;;  %v584_v25 = vsel %vm583_vm3, %v578_v16, %v580_v11 }
  0x8c   : > { %2094 = vmatmul.mubr.msk.f32.vlgmr.msra.gmra.mxu0 %vm244_vm0, %v2339_v0  ;;  %2208 = vmatprep.subr.msk.mxu0 %vm251_vm1, %v226_v4  ;;  %v582_v18 = vpop.permute.xlu0 %581 }
  0x8d   : > { %2099 = vmatprep.subr.msk.mxu1 %vm251_vm1, %v234_v3  ;;  %2209 = vmatpush3.msk.msra.mxu0 %vm251_vm1, %v226_v4  ;;  %v585_v19 = vsel %vm583_vm3, %v580_v11, %v582_v18 }
  0x8e   : > { %2100 = vmatpush1.msk.msra.mxu1 %vm251_vm1, %v2350_v2  ;;  %486 = vmatprep.mubr.f32.mxu1 %v2287_v1  ;;  %v762_v20 = vpop.permute.xlu1 %761  ;;  %v2161_v2 = vld [vmem:[%s2543_s1 + $0x88] sm:$0xff] }
  0x8f   : > { %328 = vmatprep.mubr.f32.mxu0 %v2287_v1  ;;  %2101 = vmatmul.mubr.msk.f32.vlgmr.msra.gmra.mxu1 %vm244_vm0, %v227_v17 }
  0x90   : > { %2095 = vmatmul.mubr.msk.f32.gmra.mxu0 %vm244_vm0, %v2091_v13  ;;  %2108 = vmatprep.subr.msk.mxu0 %vm251_vm1, %v585_v19  ;;  %v764_v22 = vpop.permute.xlu0 %763 }
  0x91   : > { %492 = vmatprep.mubr.f32.mxu1 %v2287_v1  ;;  %2213 = vmatprep.subr.msk.mxu1 %vm251_vm1, %v582_v18  ;;  %v767_v24 = vsel %vm765_vm4, %v762_v20, %v764_v22 }
  0x92   : > { %2210 = vmatprep.mubr.msk.f32.mxu0 %vm244_vm0, %v227_v17  ;;  %2214 = vmatpush3.msk.msra.mxu1 %vm251_vm1, %v582_v18  ;;  %v944_v26 = vpop.permute.xlu1 %943 }
  0x93   : > { %2102 = vmatmul.mubr.msk.f32.gmra.mxu1 %vm244_vm0, %v228_v21  ;;  %2117 = vmatprep.subr.msk.mxu1 %vm251_vm1, %v767_v24 }
  0x94   : > { %2211 = vmatmul.mubr.msk.f32.vlgmr.msra.gmra.mxu0 %vm244_vm0, %v228_v21  ;;  %2215 = vmatprep.mubr.msk.f32.mxu1 %vm244_vm0, %v2106_v23  ;;  %v760_v28 = vpop.permute.xlu0 %759 }
  0x95   : > { %2109 = vmatpush1.msk.msra.mxu0 %vm251_vm1, %v584_v25  ;;  %662 = vmatprep.mubr.f32.mxu0 %v2287_v1  ;;  %v766_v29 = vsel %vm765_vm4, %v760_v28, %v762_v20 }
  0x96   : > { %2218 = vmatprep.subr.msk.mxu0 %vm251_vm1, %v764_v22  ;;  %v942_v30 = vpop.permute.xlu1 %941 }
  0x97   : > { %2216 = vmatmul.mubr.msk.f32.vlgmr.msra.gmra.mxu1 %vm244_vm0, %v2107_v27  ;;  %v948_v39 = vsel %vm947_vm5, %v942_v30, %v944_v26 }
  0x98   : > { %2110 = vmatmul.mubr.msk.f32.vlgmr.msra.gmra.mxu0 %vm244_vm0, %v2106_v23  ;;  %2118 = vmatpush1.msk.msra.mxu1 %vm251_vm1, %v766_v29  ;;  %v946_v32 = vpop.permute.xlu0 %945 }
  0x99   : > { %2219 = vmatpush3.msk.msra.mxu0 %vm251_vm1, %v764_v22  ;;  %844 = vmatprep.mubr.f32.mxu1 %v2287_v1  ;;  %v949_v33 = vsel %vm947_vm5, %v944_v26, %v946_v32 }
  0x9a   : > { %668 = vmatprep.mubr.f32.mxu0 %v2287_v1  ;;  %2126 = vmatprep.subr.msk.mxu0 %vm251_vm1, %v949_v33  ;;  %v1126_v34 = vpop.permute.xlu1 %1125 }
  0x9b   : > { %2119 = vmatmul.mubr.msk.f32.vlgmr.msra.gmra.mxu1 %vm244_vm0, %v2115_v31  ;;  %2223 = vmatprep.subr.msk.mxu1 %vm251_vm1, %v946_v32 }
  0x9c   : > { %2111 = vmatmul.mubr.msk.f32.gmra.mxu0 %vm244_vm0, %v2107_v27  ;;  %850 = vmatprep.mubr.f32.mxu1 %v2287_v1  ;;  %v1128_v36 = vpop.permute.xlu0 %1127 }
  0x9d   : > { %2220 = vmatprep.mubr.msk.f32.mxu0 %vm244_vm0, %v2115_v31  ;;  %2224 = vmatpush3.msk.msra.mxu1 %vm251_vm1, %v946_v32  ;;  %v1131_v38 = vsel %vm1129_vm6, %v1126_v34, %v1128_v36 }
  0x9e   : > { %v1308_v40 = vpop.permute.xlu1 %1307  ;;  %2135 = vmatprep.subr.msk.mxu1 %vm251_vm1, %v1131_v38 }
  0x9f   : > { %2120 = vmatmul.mubr.msk.f32.gmra.mxu1 %vm244_vm0, %v2116_v35 }
  0xa0   : > { %2221 = vmatmul.mubr.msk.f32.vlgmr.msra.gmra.mxu0 %vm244_vm0, %v2116_v35  ;;  %2225 = vmatprep.mubr.msk.f32.mxu1 %vm244_vm0, %v2124_v37  ;;  %v1124_v42 = vpop.permute.xlu0 %1123 }
  0xa1   : > { %2127 = vmatpush1.msk.msra.mxu0 %vm251_vm1, %v948_v39  ;;  %1026 = vmatprep.mubr.f32.mxu0 %v2287_v1  ;;  %v1130_v43 = vsel %vm1129_vm6, %v1124_v42, %v1126_v34 }
  0xa2   : > { %2228 = vmatprep.subr.msk.mxu0 %vm251_vm1, %v1128_v36  ;;  %v1306_v44 = vpop.permute.xlu1 %1305 }
  0xa3   : > { %2226 = vmatmul.mubr.msk.f32.vlgmr.msra.gmra.mxu1 %vm244_vm0, %v2125_v41  ;;  %v1312_v53 = vsel %vm1311_vm7, %v1306_v44, %v1308_v40 }
  0xa4   : > { %2128 = vmatmul.mubr.msk.f32.vlgmr.msra.gmra.mxu0 %vm244_vm0, %v2124_v37  ;;  %2136 = vmatpush1.msk.msra.mxu1 %vm251_vm1, %v1130_v43  ;;  %v1310_v46 = vpop.permute.xlu0 %1309 }
  0xa5   : > { %2229 = vmatpush3.msk.msra.mxu0 %vm251_vm1, %v1128_v36  ;;  %1208 = vmatprep.mubr.f32.mxu1 %v2287_v1  ;;  %v1313_v47 = vsel %vm1311_vm7, %v1308_v40, %v1310_v46 }
  0xa6   : > { %1032 = vmatprep.mubr.f32.mxu0 %v2287_v1  ;;  %2144 = vmatprep.subr.msk.mxu0 %vm251_vm1, %v1313_v47  ;;  %v1490_v48 = vpop.permute.xlu1 %1489 }
  0xa7   : > { %2137 = vmatmul.mubr.msk.f32.vlgmr.msra.gmra.mxu1 %vm244_vm0, %v2133_v45  ;;  %2233 = vmatprep.subr.msk.mxu1 %vm251_vm1, %v1310_v46 }
  0xa8   : > { %2129 = vmatmul.mubr.msk.f32.gmra.mxu0 %vm244_vm0, %v2125_v41  ;;  %1214 = vmatprep.mubr.f32.mxu1 %v2287_v1  ;;  %v1492_v50 = vpop.permute.xlu0 %1491 }
  0xa9   : > { %2230 = vmatprep.mubr.msk.f32.mxu0 %vm244_vm0, %v2133_v45  ;;  %2234 = vmatpush3.msk.msra.mxu1 %vm251_vm1, %v1310_v46  ;;  %v1495_v52 = vsel %vm1493_vm8, %v1490_v48, %v1492_v50 }
  0xaa   : > { %2153 = vmatprep.subr.msk.mxu1 %vm251_vm1, %v1495_v52  ;;  %v1672_v56 = vpop.permute.xlu1 %1671 }
  0xab   : > { %2138 = vmatmul.mubr.msk.f32.gmra.mxu1 %vm244_vm0, %v2134_v49 }
  0xac   : > { %2231 = vmatmul.mubr.msk.f32.vlgmr.msra.gmra.mxu0 %vm244_vm0, %v2134_v49  ;;  %2235 = vmatprep.mubr.msk.f32.mxu1 %vm244_vm0, %v2142_v51  ;;  %v1488_v55 = vpop.permute.xlu0 %1487 }
  0xad   : > { %2145 = vmatpush1.msk.msra.mxu0 %vm251_vm1, %v1312_v53  ;;  %1390 = vmatprep.mubr.f32.mxu0 %v2287_v1  ;;  %v1494_v57 = vsel %vm1493_vm8, %v1488_v55, %v1490_v48 }
  0xae   : > { %2238 = vmatprep.subr.msk.mxu0 %vm251_vm1, %v1492_v50  ;;  %v1670_v61 = vpop.permute.xlu1 %1669 }
  0xaf   : > { %2236 = vmatmul.mubr.msk.f32.vlgmr.msra.gmra.mxu1 %vm244_vm0, %v2143_v54  ;;  %v1676_v0 = vsel %vm1675_vm9, %v1670_v61, %v1672_v56 }
  0xb0   : > { %2146 = vmatmul.mubr.msk.f32.vlgmr.msra.gmra.mxu0 %vm244_vm0, %v2142_v51  ;;  %2154 = vmatpush1.msk.msra.mxu1 %vm251_vm1, %v1494_v57  ;;  %v1674_v59 = vpop.permute.xlu0 %1673 }
  0xb1   : > { %2239 = vmatpush3.msk.msra.mxu0 %vm251_vm1, %v1492_v50  ;;  %1572 = vmatprep.mubr.f32.mxu1 %v2287_v1  ;;  %v1677_v60 = vsel %vm1675_vm9, %v1672_v56, %v1674_v59 }
  0xb2   : > { %1396 = vmatprep.mubr.f32.mxu0 %v2287_v1  ;;  %2162 = vmatprep.subr.msk.mxu0 %vm251_vm1, %v1677_v60 }
  0xb3   : > { %2155 = vmatmul.mubr.msk.f32.vlgmr.msra.gmra.mxu1 %vm244_vm0, %v2151_v58  ;;  %2243 = vmatprep.subr.msk.mxu1 %vm251_vm1, %v1674_v59 }
  0xb4   : > { %2147 = vmatmul.mubr.msk.f32.gmra.mxu0 %vm244_vm0, %v2143_v54  ;;  %1578 = vmatprep.mubr.f32.mxu1 %v2287_v1 }
  0xb5   : > { %2240 = vmatprep.mubr.msk.f32.mxu0 %vm244_vm0, %v2151_v58  ;;  %2244 = vmatpush3.msk.msra.mxu1 %vm251_vm1, %v1674_v59 }
  0xb7   : > { %2156 = vmatmul.mubr.msk.f32.gmra.mxu1 %vm244_vm0, %v2152_v62 }
  0xb8   : > { %2241 = vmatmul.mubr.msk.f32.vlgmr.msra.gmra.mxu0 %vm244_vm0, %v2152_v62  ;;  %2245 = vmatprep.mubr.msk.f32.mxu1 %vm244_vm0, %v2160_v63 }
  0xb9   : > { %2163 = vmatpush1.msk.msra.mxu0 %vm251_vm1, %v1676_v0  ;;  %1754 = vmatprep.mubr.f32.mxu0 %v2287_v1 }
  0xba   : > { %2248 = vmatprep.subr.mxu0 %v2287_v1 }
  0xbb   : > { %2246 = vmatmul.mubr.msk.f32.vlgmr.msra.gmra.mxu1 %vm244_vm0, %v2161_v2 }
  0xbc   : > { %2164 = vmatmul.mubr.msk.f32.vlgmr.msra.gmra.mxu0 %vm244_vm0, %v2160_v63  ;;  %1947 = vmatprep.mubr.f32.mxu1 %v2287_v1 }
  0xbd   : > { %1760 = vmatprep.mubr.f32.mxu0 %v2287_v1 }
  0xc0   : > { %2165 = vmatmul.mubr.msk.f32.gmra.mxu0 %vm244_vm0, %v2161_v2 }
  0xc1   : > { %2252 = vmatprep.mubr.msk.f32.mxu0 %vm2297_vm10, %v2287_v1 }
 0x14b   : > { %v2207_v3 = vpop.f32.mrf.mxu1 }
 0x14c   : > { %v324_v4 = vpop.f32.mrf.mxu0 }
 0x14d   : > { %v401_v5 = vpop.f32.mrf.mxu1 }
 0x14e   : > { %v326_v6 = vpop.f32.mrf.mxu0 }
 0x14f   : > { %v488_v7 = vpop.f32.mrf.mxu1 }
 0x150   : > { %v330_v8 = vpop.f32.mrf.mxu0  ;;  %v489_v45 = vadd.f32 %v488_v7, %v324_v4 }
 0x151   : > { %v490_v9 = vpop.f32.mrf.mxu1 }
 0x152   : > { %v332_v10 = vpop.f32.mrf.mxu0  ;;  %v491_v40 = vadd.f32 %v490_v9, %v326_v6 }
 0x153   : > { %v494_v11 = vpop.f32.mrf.mxu1 }
 0x154   : > { %v2212_v12 = vpop.f32.mrf.mxu0  ;;  %v495_v41 = vadd.f32 %v494_v11, %v330_v8 }
 0x155   : > { %v496_v13 = vpop.f32.mrf.mxu1  ;;  %v571_v31 = vadd.f32 %v2212_v12, %v2207_v3 }
 0x156   : > { %v565_v14 = vpop.f32.mrf.mxu0  ;;  %v497_v47 = vadd.f32 %v496_v13, %v332_v10 }
 0x157   : > { %v2217_v15 = vpop.f32.mrf.mxu1  ;;  %v566_v34 = vadd.f32 %v565_v14, %v401_v5 }
 0x158   : > { %v664_v16 = vpop.f32.mrf.mxu0  ;;  %v755_v37 = vadd.f32 %v2217_v15, %v571_v31  ;;  %v1853_v31 = vpop.permute.xlu1 %1852 }
 0x159   : > { %v741_v17 = vpop.f32.mrf.mxu1  ;;  %v750_v52 = vadd.f32 %v664_v16, %v489_v45 }
 0x15a   : > { %v666_v18 = vpop.f32.mrf.mxu0  ;;  %v752_v42 = vadd.f32 %v741_v17, %v566_v34 }
 0x15b   : > { %v846_v19 = vpop.f32.mrf.mxu1  ;;  %v751_v48 = vadd.f32 %v666_v18, %v491_v40 }
 0x15c   : > { %v670_v20 = vpop.f32.mrf.mxu0  ;;  %v932_v63 = vadd.f32 %v846_v19, %v750_v52 }
 0x15d   : > { %v848_v21 = vpop.f32.mrf.mxu1  ;;  %v753_v49 = vadd.f32 %v670_v20, %v495_v41 }
 0x15e   : > { %v672_v22 = vpop.f32.mrf.mxu0  ;;  %v933_v58 = vadd.f32 %v848_v21, %v751_v48 }
 0x15f   : > { %v852_v23 = vpop.f32.mrf.mxu1  ;;  %v754_v54 = vadd.f32 %v672_v22, %v497_v47  ;;  %v1872_v47 = vld [vmem:[%s2545_s3] sm:$0xff] }
 0x160   : > { %v2222_v24 = vpop.f32.mrf.mxu0  ;;  %v935_v59 = vadd.f32 %v852_v23, %v753_v49 }
 0x161   : > { %v854_v25 = vpop.f32.mrf.mxu1  ;;  %v937_v43 = vadd.f32 %v2222_v24, %v755_v37 }
 0x162   : > { %v923_v26 = vpop.f32.mrf.mxu0  ;;  %v936_v2 = vadd.f32 %v854_v25, %v754_v54  ;;  %v1858_v25 = vpop.permute.xlu0 %1857 }
 0x163   : > { %v2227_v27 = vpop.f32.mrf.mxu1  ;;  %v934_v50 = vadd.f32 %v923_v26, %v752_v42 }
 0x164   : > { %v1028_v28 = vpop.f32.mrf.mxu0  ;;  %v1119_v55 = vadd.f32 %v2227_v27, %v937_v43 }
 0x165   : > { %v1105_v29 = vpop.f32.mrf.mxu1  ;;  %v1114_v7 = vadd.f32 %v1028_v28, %v932_v63 }
 0x166   : > { %v1030_v30 = vpop.f32.mrf.mxu0  ;;  %v1116_v60 = vadd.f32 %v1105_v29, %v934_v50 }
 0x167   : > { %v1210_v32 = vpop.f32.mrf.mxu1  ;;  %v1115_v3 = vadd.f32 %v1030_v30, %v933_v58 }
 0x168   : > { %v1034_v33 = vpop.f32.mrf.mxu0  ;;  %v1296_v18 = vadd.f32 %v1210_v32, %v1114_v7 }
 0x169   : > { %v1212_v35 = vpop.f32.mrf.mxu1  ;;  %v1117_v4 = vadd.f32 %v1034_v33, %v935_v59 }
 0x16a   : > { %v1036_v36 = vpop.f32.mrf.mxu0  ;;  %v1297_v13 = vadd.f32 %v1212_v35, %v1115_v3 }
 0x16b   : > { %v1216_v38 = vpop.f32.mrf.mxu1  ;;  %v1118_v9 = vadd.f32 %v1036_v36, %v936_v2 }
 0x16c   : > { %v2232_v39 = vpop.f32.mrf.mxu0  ;;  %v1299_v14 = vadd.f32 %v1216_v38, %v1117_v4 }
 0x16d   : > { %v1218_v44 = vpop.f32.mrf.mxu1  ;;  %v1301_v61 = vadd.f32 %v2232_v39, %v1119_v55 }
 0x16e   : > { %v1287_v46 = vpop.f32.mrf.mxu0  ;;  %v1300_v19 = vadd.f32 %v1218_v44, %v1118_v9 }
 0x16f   : > { %v2237_v51 = vpop.f32.mrf.mxu1  ;;  %v1298_v5 = vadd.f32 %v1287_v46, %v1116_v60 }
 0x170   : > { %v1392_v53 = vpop.f32.mrf.mxu0  ;;  %v1483_v10 = vadd.f32 %v2237_v51, %v1301_v61 }
 0x171   : > { %v1469_v56 = vpop.f32.mrf.mxu1  ;;  %v1478_v26 = vadd.f32 %v1392_v53, %v1296_v18 }
 0x172   : > { %v1394_v57 = vpop.f32.mrf.mxu0  ;;  %v1480_v15 = vadd.f32 %v1469_v56, %v1298_v5 }
 0x173   : > { %v1574_v62 = vpop.f32.mrf.mxu1  ;;  %v1479_v21 = vadd.f32 %v1394_v57, %v1297_v13 }
 0x174   : > { %v1398_v0 = vpop.f32.mrf.mxu0  ;;  %v1660_v38 = vadd.f32 %v1574_v62, %v1478_v26 }
 0x175   : > { %v1576_v6 = vpop.f32.mrf.mxu1  ;;  %v1481_v22 = vadd.f32 %v1398_v0, %v1299_v14 }
 0x176   : > { %v1400_v8 = vpop.f32.mrf.mxu0  ;;  %v1661_v36 = vadd.f32 %v1576_v6, %v1479_v21 }
 0x177   : > { %v1580_v11 = vpop.f32.mrf.mxu1  ;;  %v1482_v29 = vadd.f32 %v1400_v8, %v1300_v19 }
 0x178   : > { %v2242_v12 = vpop.f32.mrf.mxu0  ;;  %v1663_v37 = vadd.f32 %v1580_v11, %v1481_v22 }
 0x179   : > { %v1665_v16 = vadd.f32 %v2242_v12, %v1483_v10  ;;  %v1582_v17 = vpop.f32.mrf.mxu1 }
 0x17a   : > { %v1651_v20 = vpop.f32.mrf.mxu0  ;;  %v1664_v41 = vadd.f32 %v1582_v17, %v1482_v29 }
 0x17b   : > { %v1662_v23 = vadd.f32 %v1651_v20, %v1480_v15  ;;  %v2247_v24 = vpop.f32.mrf.mxu1 }
 0x17c   : > { %v1847_v27 = vadd.f32 %v2247_v24, %v1665_v16  ;;  %v1756_v28 = vpop.f32.mrf.mxu0 }
 0x17d   : > { %v1833_v30 = vpop.f32.mrf.mxu1  ;;  %v1842_v44 = vadd.f32 %v1756_v28, %v1660_v38 }
 0x17e   : > { %v1844_v33 = vadd.f32 %v1833_v30, %v1662_v23  ;;  %v1865_v34 = vadd.f32 %v1858_v25, %v1847_v27  ;;  %v1758_v35 = vpop.f32.mrf.mxu0 }
 0x17f   : > { %v1843_v42 = vadd.f32 %v1758_v35, %v1661_v36  ;;  %v1860_v52 = vadd.f32 %v1853_v31, %v1842_v44 }
 0x180   : > { %v1871_v32 = vmax.f32 %v1865_v34, 0.0  ;;  %v1862_v39 = vadd.f32 %v1853_v31, %v1844_v33  ;;  %v1762_v40 = vpop.f32.mrf.mxu0 }
 0x181   : > { %v1845_v43 = vadd.f32 %v1762_v40, %v1663_v37  ;;  %v1861_v50 = vadd.f32 %v1853_v31, %v1843_v42  ;;  %v1866_v56 = vmax.f32 %v1860_v52, 0.0 }
 0x182   : > { %v1868_v45 = vmax.f32 %v1862_v39, 0.0  ;;  %v1764_v46 = vpop.f32.mrf.mxu0  ;;  %2249 = vmatpush3.msra.mxu0 %v1871_v32 }
 0x183   : > { %v1846_v48 = vadd.f32 %v1764_v46, %v1664_v41  ;;  %2250 = vmatprep.subr.mxu0 %v2287_v1  ;;  %v1863_v49 = vadd.f32 %v1858_v25, %v1845_v43  ;;  %v1867_v55 = vmax.f32 %v1861_v50, 0.0  ;;  %v1877_v1 = vpop.permute.xlu1 %1876 }
 0x184   : > { %2251 = vmatpush3.msra.mxu0 %v1868_v45 }
 0x185   : > { %v1864_v51 = vadd.f32 %v1858_v25, %v1846_v48  ;;  %2253 = vmatmul.mubr.msk.f32.vlgmr.msra.gmra.mxu0 %vm1879_vm11, %v1872_v47  ;;  %v1869_v54 = vmax.f32 %v1863_v49, 0.0 }
 0x187   : > { %v1870_v53 = vmax.f32 %v1864_v51, 0.0 }
 0x189   : > { %1911 = vmatprep.subr.mxu1 %v1870_v53 }
 0x18a   : > { %1912 = vmatpush1.msra.mxu1 %v1869_v54 }
 0x18b   : > { %1913 = vmatprep.subr.mxu1 %v1867_v55 }
 0x18c   : > { %1914 = vmatpush1.msra.mxu1 %v1866_v56 }
 0x18d   : > { %2169 = vmatmul.mubr.msk.f32.vlgmr.msra.gmra.mxu1 %vm1879_vm11, %v1872_v47 }
 0x245   : > { %v2020_v57 = vpop.f32.mrf.mxu0 }
 0x246   : > { %v2021_v58 = vadd.f32 %v2020_v57, %v1877_v1 }
 0x247   : > { %v2254_v59 = vpop.f32.mrf.mxu0 }
 0x248   : > { %2027 = vst.msk [vmem:[%s224_s8 + $0x10] sm:$0xff] %vm2026_vm12, %v2021_v58 }
 0x24d   : > { %v1949_v60 = vpop.f32.mrf.mxu1 }
 0x24e   : > { %v1950_v61 = vadd.f32 %v1949_v60, %v1877_v1 }
 0x24f   : > { %v1951_v62 = vpop.f32.mrf.mxu1 }
 0x250   : > { %2024 = vst [vmem:[%s224_s8] sm:$0xff] %v1950_v61  ;;  %v1952_v63 = vadd.f32 %v1951_v62, %v1877_v1 }
 0x252   : > { %2025 = vst [vmem:[%s224_s8 + $0x8] sm:$0xff] %v1952_v63 }
 0x253 PF: > { %s15_s18 = sadd.s32 1, %s2285_s18  }
 0x254   : > { %p12_p4 = scmp.ge.s32.totalorder %s15_s18, 4  }
 0x256   :  { %14 = sbr.rel (!%p12_p4) target bundleno = 1 (0x1), region = 78 }

</bundles_post_ra>
